<compile_context>
chip_gen: v7x
topology: tpu7x:2x2x1
jax: 0.10.0
libtpu: 0.0.40
codegen_flags: <defaults>
</compile_context>

<pallas_src>
import jax
import jax.numpy as jnp
from jax import lax
from jax.experimental import pallas as pl
from jax.experimental.pallas import tpu as pltpu

BN_EPS = 1e-5
LANE = 128
SUBLANE_BF16 = 16          # bf16 packs (16, 128) vregs -> keep row tiles multiples of 16
MAX_ROW_TILE = 8192


def _round_up(x, m):
    return (x + m - 1) // m * m


# ------------------------------------------------------------------ kernels
def _conv_stats_kernel(patches_ref, w_ref, conv_ref, stats_ref):
    """Pass 1 (row-parallel): conv tile on the MXU (f32 accumulation), bf16 conv spill,
    per-tile BN partial sums (sum, sum of squares) for this row tile."""
    conv = jnp.dot(patches_ref[...], w_ref[...], preferred_element_type=jnp.float32)
    conv_ref[...] = conv.astype(conv_ref.dtype)
    # Two sublane-slice stores; no concatenate and no serial resident accumulator.
    stats_ref[0:1, :] = jnp.sum(conv, axis=0, keepdims=True)
    stats_ref[1:2, :] = jnp.sum(conv * conv, axis=0, keepdims=True)


def _bn_mish_kernel(conv_ref, scale_ref, shift_ref, out_ref):
    """Pass 2 (row-parallel, purely elementwise): BN affine + Mish."""
    y = conv_ref[...].astype(jnp.float32) * scale_ref[...] + shift_ref[...]
    # Mish: y * tanh(softplus(y)); tanh(log(1+e)) == (e^2 + 2e) / (e^2 + 2e + 2), e = exp(y).
    # Clamp at 20 (PyTorch softplus threshold; tanh saturated there):
    # one EUP exp + one approx reciprocal instead of exp + log1p + tanh.
    e = jnp.exp(jnp.minimum(y, 20.0))
    num = e * (e + 2.0)
    t = num * pl.reciprocal(num + 2.0, approx=True)
    out_ref[...] = (y * t).astype(out_ref.dtype)


# ------------------------------------------------------------------ tiling helpers
def _vmem_limit_bytes():
    """Generation-aware scoped-VMEM budget (v5e/v6e: 128 MiB physical, v7x: 64 MiB per TC)."""
    cap = None
    try:
        cap = getattr(pltpu.get_tpu_info(), "vmem_capacity_bytes", None)
    except Exception:
        cap = None
    if not cap:
        cap = 64 << 20                        # conservative fallback (v7x per-core VMEM)
    return int(min(cap * 3 // 4, 96 << 20))   # v5e/v6e -> 96 MiB, v7x -> 48 MiB


def _pick_row_tile(rows, kk, cout, vmem_limit, out_itemsize):
    """Largest row tile whose double-buffered working set fits the VMEM budget."""
    kk_l = _round_up(kk, LANE)                # VMEM lane padding of the minor dims
    co_l = _round_up(cout, LANE)
    pass1 = 2 * kk_l * 2 + 2 * co_l * 2 + co_l * 4              # patches + conv spill (+ f32 temp)
    pass2 = 2 * co_l * 2 + 2 * co_l * out_itemsize + co_l * 4   # conv in + out (+ f32 temp)
    per_row = max(pass1, pass2)
    fixed = 2 * kk * co_l * 2 + (1 << 20)                        # weight block (x2 bufs) + margin
    budget = max(vmem_limit // 2 - fixed, 1 << 20)
    tile = (budget // per_row) // SUBLANE_BF16 * SUBLANE_BF16
    return max(SUBLANE_BF16, min(tile, MAX_ROW_TILE, _round_up(rows, SUBLANE_BF16)))


# ------------------------------------------------------------------ wrapper
def basic_conv(x, weight, gamma, beta, kernel_size, stride=1, *,
               row_tile=None, out_dtype=jnp.float32, spill_dtype=jnp.bfloat16):
    """x: (N, Cin, H, W).  weight: (Cout, Cin, k, k).  Returns (N, Cout, OH, OW) in out_dtype."""
    n, cin, h, w = x.shape
    cout = weight.shape[0]
    k = kernel_size
    pad = k // 2                                  # exactly nn.Conv2d(..., padding=kernel_size // 2)
    oh = (h + 2 * pad - k) // stride + 1
    ow = (w + 2 * pad - k) // stride + 1
    rows = n * oh * ow
    kk = cin * k * k

    # --- slim im2col: bf16, feature order (kh, kw, cin), no k^2-inflated transpose ---
    # (bf16 operand streams with f32 MXU accumulation is a deliberate precision tradeoff.)
    x_nhwc = jnp.transpose(x, (0, 2, 3, 1)).astype(jnp.bfloat16)
    xp = jnp.pad(x_nhwc, ((0, 0), (pad, pad), (pad, pad), (0, 0)))
    cols = [xp[:, kh:kh + stride * oh:stride, kw:kw + stride * ow:stride, :]
            for kh in range(k) for kw in range(k)]
    patches = jnp.stack(cols, axis=3).reshape(rows, kk)          # (rows, k*k*Cin) bf16

    # Weight laid out to match the (kh, kw, cin) feature order.
    w_mat = jnp.transpose(weight.astype(jnp.float32), (2, 3, 1, 0)) \
               .reshape(kk, cout).astype(jnp.bfloat16)

    vmem_limit = _vmem_limit_bytes()
    out_itemsize = jnp.dtype(out_dtype).itemsize
    if row_tile is None:
        row_tile = _pick_row_tile(rows, kk, cout, vmem_limit, out_itemsize)
    row_tile = max(SUBLANE_BF16,
                   _round_up(min(row_tile, _round_up(rows, SUBLANE_BF16)), SUBLANE_BF16))
    rows_pad = _round_up(rows, row_tile)
    n_tiles = rows_pad // row_tile
    if rows_pad != rows:       # zero rows contribute 0 to the BN sums; sliced off at the end
        patches = jnp.pad(patches, ((0, rows_pad - rows), (0, 0)))

    cparams = pltpu.CompilerParams(dimension_semantics=("parallel",),
                                   vmem_limit_bytes=vmem_limit)

    # ---- pass 1: conv (bf16 spill) + per-tile BN partial sums ----
    conv_flat, stats = pl.pallas_call(
        _conv_stats_kernel,
        out_shape=(jax.ShapeDtypeStruct((rows_pad, cout), spill_dtype),
                   jax.ShapeDtypeStruct((n_tiles, 2, cout), jnp.float32)),
        grid_spec=pltpu.PrefetchScalarGridSpec(
            num_scalar_prefetch=0,
            grid=(n_tiles,),
            in_specs=[pl.BlockSpec((row_tile, kk), lambda i: (i, 0)),
                      pl.BlockSpec((kk, cout), lambda i: (0, 0))],
            out_specs=(pl.BlockSpec((row_tile, cout), lambda i: (i, 0)),
                       pl.BlockSpec((None, 2, cout), lambda i: (i, 0, 0)))),
        compiler_params=cparams,
    )(patches, w_mat)

    # Tiny JAX epilogue: training-mode BatchNorm2d statistics (biased batch variance).
    totals = jnp.sum(stats, axis=0)                  # (2, Cout); padded rows contributed 0
    count = jnp.float32(rows)                        # divide by the *real* row count
    mean = totals[0] / count
    var = jnp.maximum(totals[1] / count - mean * mean, 0.0)
    inv = lax.rsqrt(var + BN_EPS)
    g = gamma.astype(jnp.float32)
    scale = (g * inv).reshape(1, cout)
    shift = (beta.astype(jnp.float32) - mean * g * inv).reshape(1, cout)

    # ---- pass 2: BN affine + Mish, purely elementwise, no padded channels written ----
    out_flat = pl.pallas_call(
        _bn_mish_kernel,
        out_shape=jax.ShapeDtypeStruct((rows_pad, cout), out_dtype),
        grid_spec=pltpu.PrefetchScalarGridSpec(
            num_scalar_prefetch=0,
            grid=(n_tiles,),
            in_specs=[pl.BlockSpec((row_tile, cout), lambda i: (i, 0)),
                      pl.BlockSpec((1, cout), lambda i: (0, 0)),
                      pl.BlockSpec((1, cout), lambda i: (0, 0))],
            out_specs=pl.BlockSpec((row_tile, cout), lambda i: (i, 0))),
        compiler_params=cparams,
    )(conv_flat, scale, shift)

    # (rows, Cout) -> (N, OH, OW, Cout) -> NCHW (small, non-inflated, non-channel-padded).
    out = out_flat[:rows].reshape(n, oh, ow, cout)
    return jnp.transpose(out, (0, 3, 1, 2))


# ------------------------------------------------------------------ reference + smoke test
def _reference(x, weight, gamma, beta, kernel_size, stride):
    pad = kernel_size // 2
    conv = lax.conv_general_dilated(x, weight, (stride, stride), ((pad, pad), (pad, pad)),
                                    dimension_numbers=("NCHW", "OIHW", "NCHW"))
    mean = jnp.mean(conv, axis=(0, 2, 3), keepdims=True)
    var = jnp.var(conv, axis=(0, 2, 3), keepdims=True)           # biased, train-mode BN
    y = (conv - mean) * lax.rsqrt(var + BN_EPS)
    y = y * gamma.reshape(1, -1, 1, 1) + beta.reshape(1, -1, 1, 1)
    return y * jnp.tanh(jnp.logaddexp(y, 0.0))                   # Mish


if __name__ == "__main__":
    # BasicConv(in_channels=4, out_channels=8, kernel_size=3, stride=1) on a (2, 4, 16, 16) input.
    N, CIN, COUT, H, W, K, STRIDE = 2, 4, 8, 16, 16, 3, 1

    key = jax.random.PRNGKey(0)
    kx, kw = jax.random.split(key)
    x = jax.random.normal(kx, (N, CIN, H, W), dtype=jnp.float32)
    weight = 0.1 * jax.random.normal(kw, (COUT, CIN, K, K), dtype=jnp.float32)  # Conv2d bias=False
    gamma = jnp.ones((COUT,), dtype=jnp.float32)   # BatchNorm2d default init
    beta = jnp.zeros((COUT,), dtype=jnp.float32)

    # row_tile=128 -> 4 grid steps: exercises multi-tile stats reduction + pipelining.
    out = basic_conv(x, weight, gamma, beta, kernel_size=K, stride=STRIDE, row_tile=128)
    jax.block_until_ready(out)
    assert out.shape == (N, COUT, H, W)
    assert bool(jnp.all(jnp.isfinite(out)))

    # Loose-tolerance check against a pure-JAX f32 reference (kernel uses bf16 operand streams).
    ref = _reference(x, weight, gamma, beta, K, STRIDE)
    max_err = float(jnp.max(jnp.abs(out.astype(jnp.float32) - ref)))
    assert max_err < 0.15, f"max abs error vs reference: {max_err}"
    print("KERNEL_OK")
</pallas_src>

<mosaic_0001>
module attributes {stable_mosaic.version = 11 : i64} {
  func.func @_conv_stats_kernel(%arg0: i32, %arg1: memref<128x36xbf16, #tpu.memory_space<vmem>>, %arg2: memref<36x8xbf16, #tpu.memory_space<vmem>>, %arg3: memref<128x8xbf16, #tpu.memory_space<vmem>>, %arg4: memref<1x2x8xf32, #tpu.memory_space<vmem>>) attributes {dimension_semantics = [#tpu.dimension_semantics<parallel>], iteration_bounds = array<i64: 4>, scalar_prefetch = 0 : i64, scratch_operands = 0 : i64, tpu.core_type = #tpu.core_type<tc>, window_params = [{transform_indices = @transform_0, window_bounds = array<i64: 128, 36>}, {pipeline_mode = #tpu.pipeline_mode<synchronous>, transform_indices = @transform_1, window_bounds = array<i64: 36, 8>}, {transform_indices = @transform_2, window_bounds = array<i64: 128, 8>}, {transform_indices = @transform_3, window_bounds = array<i64: 1, 2, 8>}]} {
    %c0 = arith.constant 0 : index
    %c0_0 = arith.constant 0 : index
    %0 = vector.load %arg1[%c0, %c0_0] : memref<128x36xbf16, #tpu.memory_space<vmem>>, vector<128x36xbf16>
    %c0_1 = arith.constant 0 : index
    %c0_2 = arith.constant 0 : index
    %1 = vector.load %arg2[%c0_1, %c0_2] : memref<36x8xbf16, #tpu.memory_space<vmem>>, vector<36x8xbf16>
    %cst = arith.constant dense<0.000000e+00> : vector<128x8xf32>
    %2 = tpu.matmul %0, %1, %cst {dimension_numbers = #tpu.dot_dimension_numbers<[1], [0], [0], [1], [0, 0, 1, 1], [], []>} : vector<128x36xbf16>, vector<36x8xbf16>, vector<128x8xf32> -> vector<128x8xf32>
    %3 = arith.truncf %2 : vector<128x8xf32> to vector<128x8xbf16>
    %c0_3 = arith.constant 0 : index
    %c0_4 = arith.constant 0 : index
    %4 = vector.load %arg3[%c0_3, %c0_4] : memref<128x8xbf16, #tpu.memory_space<vmem>>, vector<128x8xbf16>
    tpu.vector_store %arg3[%c0_3, %c0_4], %3 {strides = array<i32>} : memref<128x8xbf16, #tpu.memory_space<vmem>>, vector<128x8xbf16>,
    %cst_5 = arith.constant dense<0.000000e+00> : vector<8xf32>
    %5 = vector.multi_reduction <add>, %2, %cst_5 [0] : vector<128x8xf32> to vector<8xf32>
    %6 = vector.shape_cast %5 : vector<8xf32> to vector<1x8xf32>
    %c0_6 = arith.constant 0 : index
    %c0_7 = arith.constant 0 : index
    %c0_8 = arith.constant 0 : index
    %7 = vector.load %arg4[%c0_6, %c0_7, %c0_8] : memref<1x2x8xf32, #tpu.memory_space<vmem>>, vector<1x1x8xf32>
    %8 = vector.shape_cast %7 : vector<1x1x8xf32> to vector<1x8xf32>
    %9 = vector.shape_cast %6 : vector<1x8xf32> to vector<1x1x8xf32>
    tpu.vector_store %arg4[%c0_6, %c0_7, %c0_8], %9 {strides = array<i32>} : memref<1x2x8xf32, #tpu.memory_space<vmem>>, vector<1x1x8xf32>,
    %10 = arith.mulf %2, %2 : vector<128x8xf32>
    %cst_9 = arith.constant dense<0.000000e+00> : vector<8xf32>
    %11 = vector.multi_reduction <add>, %10, %cst_9 [0] : vector<128x8xf32> to vector<8xf32>
    %12 = vector.shape_cast %11 : vector<8xf32> to vector<1x8xf32>
    %c0_10 = arith.constant 0 : index
    %c1 = arith.constant 1 : index
    %c0_11 = arith.constant 0 : index
    %13 = vector.load %arg4[%c0_10, %c1, %c0_11] : memref<1x2x8xf32, #tpu.memory_space<vmem>>, vector<1x1x8xf32>
    %14 = vector.shape_cast %13 : vector<1x1x8xf32> to vector<1x8xf32>
    %15 = vector.shape_cast %12 : vector<1x8xf32> to vector<1x1x8xf32>
    tpu.vector_store %arg4[%c0_10, %c1, %c0_11], %15 {strides = array<i32>} : memref<1x2x8xf32, #tpu.memory_space<vmem>>, vector<1x1x8xf32>,
    return
  }
  func.func @transform_0(%arg0: i32) -> (i32, i32) {
    %c0_i32 = arith.constant 0 : i32
    %c0_i32_0 = arith.constant 0 : i32
    return %arg0, %c0_i32 : i32, i32
  }
  func.func @transform_1(%arg0: i32) -> (i32, i32) {
    %c0_i32 = arith.constant 0 : i32
    %c0_i32_0 = arith.constant 0 : i32
    %c0_i32_1 = arith.constant 0 : i32
    return %c0_i32, %c0_i32_0 : i32, i32
  }
  func.func @transform_2(%arg0: i32) -> (i32, i32) {
    %c0_i32 = arith.constant 0 : i32
    %c0_i32_0 = arith.constant 0 : i32
    return %arg0, %c0_i32 : i32, i32
  }
  func.func @transform_3(%arg0: i32) -> (i32, i32, i32) {
    %c0_i32 = arith.constant 0 : i32
    %c0_i32_0 = arith.constant 0 : i32
    %c0_i32_1 = arith.constant 0 : i32
    return %arg0, %c0_i32, %c0_i32_0 : i32, i32, i32
  }
}

</mosaic_0001>

<bundles_post_ra>
// kernel: tpu_custom_call.1
= control target key start
LH: loop header
LB: loop body
LE: loop exit
PB: predicated region body
PF: predicated region fallthrough
CT: control target
= control target key end

     0   :  { %9 = vsyncpa [#allocation3], 0  ;;  %s1140_s0 = inlined_call_operand.vmem [shape: bf16[512,36], index: 0, kind: input, shape index: {}]   ;;  %s1141_s1 = inlined_call_operand.vmem [shape: bf16[36,8], index: 1, kind: input, shape index: {}]   ;;  %s1142_s2 = inlined_call_operand.vmem [shape: bf16[512,8], index: 2, kind: output, shape index: {0}]   ;;  %s1143_s3 = inlined_call_operand.hbm [shape: f32[4,2,8], index: 3, kind: output, shape index: {1}]  }
   0x1   :  { %11 = vsyncpa [#allocation3 + $0x1], 0  ;;  %s910_s12 = smov 0   ;;  %s912_s13 = smov 0  }
   0x2   :  { %s914_s14 = smov 0   ;;  %s916_s15 = smov 0  }
   0x3 LB: > { %s931_s16 = sadd.s32 4294967295, %s887_s15   ;;  %s670_s17 = sadd.s32 4294967294, %s887_s15   ;;  %s887_s15 = sphi %s916_s15, %s1149_s15   ;;  %s883_s14 = sphi %s914_s14, %s1148_s14   ;;  %s879_s13 = sphi %s912_s13, %s1147_s13   ;;  %s875_s12 = sphi %s910_s12, %s1146_s12  }
   0x4   : > { %s935_s18 = sadd.s32 1, %s887_s15   ;;  %s97_s19 = sadd.s32 1, %s883_s14 }
   0x5   : > { %s94_s20 = ssub.s32 %s887_s15, %s935_s18  ;;  %p107_p0 = scmp.ne.s32.totalorder %s883_s14, %s879_s13 }
   0x6   : > { %p95_p1 = scmp.eq.s32.totalorder %s94_s20, 0  ;;  %p108_p2 = scmp.eq.s32.totalorder %s931_s16, 3 }
   0x7   : > { %p113_p3 = scmp.ne.s32.totalorder %s879_s13, %s875_s12  ;;  %p114_p4 = scmp.eq.s32.totalorder %s670_s17, 3 }
   0x8   : > { %s946_s21 = scalar_select %p95_p1, %s883_s14, %s97_s19  }
   0x9   : > { %p948_p5 = por %p108_p2, %p107_p0  ;;  %p952_p6 = por %p114_p4, %p113_p3 }
   0xa   : > { %p673_p7 = scmp.ge.s32.totalorder %s887_s15, 1  ;;  %p144_p8 = scmp.lt.s32.totalorder %s887_s15, 5 }
   0xc   : > { %p145_p9 = pnand %p673_p7, %p144_p8 }
   0xd   : > { %v814_v0 = vld [vmem:[%s1141_s1] sm:$0xff] (!%p145_p9)   ;;  %v815_v1 = vld [vmem:[%s1141_s1 + $0x8] sm:$0xff] (!%p145_p9)   ;;  %s675_s28 = sshll.u32 (!%p145_p9), %s931_s16, 4  ;;  %v816_v2 = vld [vmem:[%s1141_s1 + $0x10] ss:$0 sps:$4 sm:$0x33] (!%p145_p9)  }
   0xe   : > { %148 = sbr.rel (%p145_p9) target bundleno = 300 (0x12c), region = 28  ;;  %745 = vmatprep.subr.bf16.mxu0 (!%p145_p9), %v814_v0  ;;  %p174_p10 = scmp.lt.s32.totalorder (!%p145_p9), %s675_s28, 63  ;;  %767 = vmatprep.subr.bf16.mxu1 (!%p145_p9), %v814_v0  ;;  %vm287_vm0 = vcmask (!%p145_p9), 1041408   ;;  %vm262_vm1 = vcmask (!%p145_p9), 293888   ;;  %vm452_vm2 = vcmask (!%p145_p9), 60416   ;;  %vm469_vm3 = vcmask (!%p145_p9), 64512  }
   0xf   : > { %746 = vmatpush3.bf16.msra.mxu0 (!%p145_p9), %v814_v0  ;;  %770 = vmatpush3.bf16.msra.mxu1 (!%p145_p9), %v814_v0  ;;  %v289_v3 = vsel (!%p145_p9), %vm287_vm0, %v816_v2, 0  ;;  %s170_s11 = sand.u32 (!%p145_p9), 1, %s879_s13   ;;  %vm507_vm4 = vcmask (!%p145_p9), 57344   ;;  %s715_s19 = sshll.u32 (!%p145_p9), %s931_s16, 5 }
  0x10   : > { %747 = vmatprep.subr.bf16.mxu0 (!%p145_p9), %v815_v1  ;;  %768 = vmatprep.subr.bf16.mxu1 (!%p145_p9), %v815_v1  ;;  %s674_s17 = sshll.u32 (!%p145_p9), %s170_s11, 1  ;;  %s1098_s27 = scalar_lea.hbm (!%p145_p9), %s1143_s3, %s715_s19 }
  0x11   : > { %s172_s20 = scalar_lea.vmem (!%p145_p9), [#allocation2], %s674_s17  ;;  %s889_s16 = smov (!%p145_p9), [#allocation2]  }
  0x12   : > { %s586_s24 = sshll.u32 (!%p145_p9), %s172_s20, 4  ;;  %s829_s30 = sshll.u32 (!%p145_p9), %s889_s16, 4  ;;  %s1100_s24 = int_to_ptr.vmem [resolvable:$true] %s586_s24  ;;  %s830_s30 = int_to_ptr.vmem [resolvable:$false] %s829_s30 }
  0x13   : > { %748 = vmatpush3.bf16.msra.mxu0 (!%p145_p9), %v815_v1  ;;  %771 = vmatpush3.bf16.msra.mxu1 (!%p145_p9), %v815_v1  ;;  %s825_s29 = scalar_lea.vmem (!%p145_p9), %s1100_s24, 32  ;;  %p832_p0 = scmp.lt.s32.totalorder (!%p145_p9), %s1100_s24, %s830_s30 }
  0x14   : > { %773 = vmatprep.subr.msk.bf16.mxu0 (!%p145_p9), %vm287_vm0, %v816_v2  ;;  %774 = vmatprep.subr.msk.bf16.mxu1 (!%p145_p9), %vm287_vm0, %v816_v2  ;;  %p826_p11 = scmp.ne.s32.totalorder (!%p145_p9), %s1100_s24, %s825_s29 }
  0x15   : > { %s1151_s28 = smov (!%p174_p10, %s675_s28), 63 }
  0x16   : > { %s676_s4 = sshll.u32 %s1151_s28, 2  ;;  %s569_s28 = scalar_lea.sflag [#allocation3], %s170_s11 }
  0x17   : > { %s177_s7 = scalar_lea.vmem %s1140_s0, %s676_s4  ;;  %750 = vmatpush3.bf16.msra.mxu0 %v289_v3  ;;  %772 = vmatpush3.bf16.msra.mxu1 %v289_v3  ;;  %s985_s10 = scalar_lea.vmem %s1142_s2, %s676_s4 }
  0x18   : > { %v817_v4 = vld [vmem:[%s177_s7] sm:$0xff]   ;;  %v818_v5 = vld [vmem:[%s177_s7 + $0x8] sm:$0xff]   ;;  %v819_v6 = vld [vmem:[%s177_s7 + $0x10] sm:$0xff]   ;;  %p827_p12 = pnand %p826_p11, %p948_p5  ;;  %s831_s4 = scalar_lea.vmem %s830_s30, 64 }
  0x19   : > { %751 = vmatprep.mubr.msk.bf16.mxu0 %vm262_vm1, %v817_v4  ;;  %v821_v7 = vld [vmem:[%s177_s7 + $0x20] sm:$0xff]   ;;  %v822_v8 = vld [vmem:[%s177_s7 + $0x28] sm:$0xff]   ;;  %v823_v9 = vld [vmem:[%s177_s7 + $0x30] sm:$0xff]   ;;  %p833_p1 = scmp.lt.s32.totalorder %s831_s4, %s825_s29 }
  0x1a   : > { %752 = vmatmul.mubr.msk.bf16.vlgmr.msra.gmra.mrb[0].mxu0 %vm262_vm1, %v818_v5  ;;  %759 = vmatprep.mubr.msk.bf16.mxu1 %vm262_vm1, %v821_v7  ;;  %v820_v10 = vld [vmem:[%s177_s7 + $0x18] sm:$0xff]   ;;  %p828_p13 = pneg %p827_p12 }
  0x1b   : > { %755 = vmatprep.mubr.msk.bf16.mxu0 %vm262_vm1, %v819_v6  ;;  %760 = vmatmul.mubr.msk.bf16.vlgmr.msra.gmra.mrb[0].mxu1 %vm262_vm1, %v822_v8  ;;  %v824_v11 = vld [vmem:[%s177_s7 + $0x38] sm:$0xff]   ;;  %p834_p2 = por %p833_p1, %p832_p0 }
  0x1c   : > { %763 = vmatprep.mubr.msk.bf16.mxu1 %vm262_vm1, %v823_v9 }
  0x1d   : > { %p835_p3 = pnand %p834_p2, %p828_p13 }
  0x22   : > { %756 = vmatmul.mubr.msk.bf16.gmra.mrb[4].mxu0 %vm262_vm1, %v820_v10 }
  0x23   : > { %764 = vmatmul.mubr.msk.bf16.gmra.mrb[4].mxu1 %vm262_vm1, %v824_v11 }
  0xed   : > { %v753_v12 = vpop.f32.mrb[0].mxu0 }
  0xee   : > { %v720_v13 = vpack.c.bf16 %v753_v12, %v753_v12  ;;  %v325_v14 = vpop.f32.mrb[1].mxu0  ;;  %v987_v15 = vpop.f32.mrb[0].mxu1  ;;  %v511_v21 = vmul.f32 %v753_v12, %v753_v12  ;;  %v473_v32 = vsel %vm469_vm3, %v753_v12, 0.0 }
  0xef   : > { %v718_v16 = vpack.c.bf16 %v325_v14, %v325_v14  ;;  %v509_v17 = vmul.f32 %v325_v14, %v325_v14  ;;  %v754_v18 = vpop.f32.mrb[2].mxu0  ;;  %v728_v19 = vpack.c.bf16 %v987_v15, %v987_v15  ;;  %v991_v20 = vpop.f32.mrb[1].mxu1  ;;  %v470_v25 = vsel %vm469_vm3, %v325_v14, 0.0 }
  0xf0   : > { %455 = vst.msk [vmem:[%s985_s10 + $0x8] sm:$0xf] %vm452_vm2, %v720_v13  ;;  %v721_v22 = vpack.c.bf16 %v754_v18, %v754_v18  ;;  %v328_v23 = vpop.f32.mrb[3].mxu0  ;;  %v995_v24 = vpop.f32.mrb[2].mxu1  ;;  %v512_v30 = vmul.f32 %v754_v18, %v754_v18  ;;  %v726_v35 = vpack.c.bf16 %v991_v20, %v991_v20  ;;  %v528_v39 = vsel %vm469_vm3, %v511_v21, 0.0 }
  0xf1   : > { %453 = vst.msk [vmem:[%s985_s10] sm:$0xf] %vm452_vm2, %v718_v16  ;;  %v719_v26 = vpack.c.bf16 %v328_v23, %v328_v23  ;;  %v471_v27 = vsel %vm469_vm3, %v328_v23, 0.0  ;;  %v510_v28 = vmul.f32 %v328_v23, %v328_v23  ;;  %463 = vst.msk [vmem:[%s985_s10 + $0x28] sm:$0xf] %vm452_vm2, %v728_v19  ;;  %v1003_v29 = vpop.f32.mrb[3].mxu1  ;;  %v729_v38 = vpack.c.bf16 %v995_v24, %v995_v24 }
  0xf2   : > { %456 = vst.msk [vmem:[%s985_s10 + $0xc] sm:$0xf] %vm452_vm2, %v721_v22  ;;  %v472_v31 = vadd.f32 %v471_v27, %v470_v25  ;;  %v525_v33 = vsel %vm469_vm3, %v509_v17, 0.0  ;;  %461 = vst.msk [vmem:[%s985_s10 + $0x20] sm:$0xf] %vm452_vm2, %v726_v35  ;;  %v727_v41 = vpack.c.bf16 %v1003_v29, %v1003_v29  ;;  %v475_v42 = vsel %vm469_vm3, %v754_v18, 0.0 }
  0xf3   : > { %454 = vst.msk [vmem:[%s985_s10 + $0x4] sm:$0xf] %vm452_vm2, %v719_v26  ;;  %v526_v34 = vsel %vm469_vm3, %v510_v28, 0.0  ;;  %v530_v43 = vsel %vm469_vm3, %v512_v30, 0.0  ;;  %464 = vst.msk [vmem:[%s985_s10 + $0x2c] sm:$0xf] %vm452_vm2, %v729_v38  ;;  %v517_v3 = vmul.f32 %v991_v20, %v991_v20  ;;  %v518_v21 = vmul.f32 %v1003_v29, %v1003_v29 }
  0xf4   : > { %v474_v36 = vadd.f32 %v473_v32, %v472_v31  ;;  %v527_v37 = vadd.f32 %v526_v34, %v525_v33  ;;  %462 = vst.msk [vmem:[%s985_s10 + $0x24] sm:$0xf] %vm452_vm2, %v727_v41  ;;  %v485_v13 = vsel %vm469_vm3, %v991_v20, 0.0  ;;  %v519_v25 = vmul.f32 %v987_v15, %v987_v15 }
  0xf5   : > { %v757_v40 = vpop.f32.mrb[4].mxu0  ;;  %v540_v19 = vsel %vm469_vm3, %v517_v3, 0.0  ;;  %v487_v26 = vsel %vm469_vm3, %v1003_v29, 0.0  ;;  %v489_v30 = vsel %vm469_vm3, %v987_v15, 0.0  ;;  %v520_v31 = vmul.f32 %v995_v24, %v995_v24 }
  0xf6   : > { %v529_v44 = vadd.f32 %v528_v39, %v527_v37  ;;  %v724_v45 = vpack.c.bf16 %v757_v40, %v757_v40  ;;  %v341_v46 = vpop.f32.mrb[5].mxu0  ;;  %v1025_v47 = vpop.f32.mrb[4].mxu1  ;;  %v476_v49 = vadd.f32 %v475_v42, %v474_v36  ;;  %v515_v62 = vmul.f32 %v757_v40, %v757_v40 }
  0xf7   : > { %v722_v48 = vpack.c.bf16 %v341_v46, %v341_v46  ;;  %v477_v50 = vsel %vm469_vm3, %v341_v46, 0.0  ;;  %v513_v51 = vmul.f32 %v341_v46, %v341_v46  ;;  %v758_v52 = vpop.f32.mrb[6].mxu0  ;;  %v373_v53 = vpop.f32.mrb[5].mxu1  ;;  %v481_v4 = vsel %vm469_vm3, %v757_v40, 0.0 }
  0xf8   : > { %459 = vst.msk [vmem:[%s985_s10 + $0x18] sm:$0xf] %vm452_vm2, %v724_v45  ;;  %v531_v54 = vadd.f32 %v530_v43, %v529_v44  ;;  %v725_v55 = vpack.c.bf16 %v758_v52, %v758_v52  ;;  %v344_v56 = vpop.f32.mrb[7].mxu0  ;;  %v1032_v57 = vpop.f32.mrb[6].mxu1  ;;  %v478_v58 = vadd.f32 %v477_v50, %v476_v49  ;;  %v516_v5 = vmul.f32 %v758_v52, %v758_v52 }
  0xf9   : > { %457 = vst.msk [vmem:[%s985_s10 + $0x10] sm:$0xf] %vm452_vm2, %v722_v48  ;;  %v532_v59 = vsel %vm469_vm3, %v513_v51, 0.0  ;;  %v723_v60 = vpack.c.bf16 %v344_v56, %v344_v56  ;;  %v376_v61 = vpop.f32.mrb[7].mxu1  ;;  %v479_v0 = vsel %vm469_vm3, %v344_v56, 0.0  ;;  %v514_v1 = vmul.f32 %v344_v56, %v344_v56 }
  0xfa   : > { %v533_v63 = vadd.f32 %v532_v59, %v531_v54  ;;  %460 = vst.msk [vmem:[%s985_s10 + $0x1c] sm:$0xf] %vm452_vm2, %v725_v55  ;;  %v480_v2 = vadd.f32 %v479_v0, %v478_v58  ;;  %v732_v7 = vpack.c.bf16 %v1025_v47, %v1025_v47  ;;  %v730_v10 = vpack.c.bf16 %v373_v53, %v373_v53 }
  0xfb   : > { %458 = vst.msk [vmem:[%s985_s10 + $0x14] sm:$0xf] %vm452_vm2, %v723_v60  ;;  %v534_v6 = vsel %vm469_vm3, %v514_v1, 0.0  ;;  %v536_v11 = vsel %vm469_vm3, %v515_v62, 0.0  ;;  %v483_v12 = vsel %vm469_vm3, %v758_v52, 0.0  ;;  %v733_v14 = vpack.c.bf16 %v1032_v57, %v1032_v57 }
  0xfc   : > { %v482_v8 = vadd.f32 %v481_v4, %v480_v2  ;;  %v535_v9 = vadd.f32 %v534_v6, %v533_v63  ;;  %467 = vst.msk [vmem:[%s985_s10 + $0x38] sm:$0xf] %vm452_vm2, %v732_v7  ;;  %465 = vst.msk [vmem:[%s985_s10 + $0x30] sm:$0xf] %vm452_vm2, %v730_v10  ;;  %v538_v18 = vsel %vm469_vm3, %v516_v5, 0.0  ;;  %v731_v22 = vpack.c.bf16 %v376_v61, %v376_v61 }
  0xfd   : > { %468 = vst.msk [vmem:[%s985_s10 + $0x3c] sm:$0xf] %vm452_vm2, %v733_v14  ;;  %v542_v32 = vsel %vm469_vm3, %v518_v21, 0.0  ;;  %v521_v33 = vmul.f32 %v373_v53, %v373_v53  ;;  %v544_v36 = vsel %vm469_vm3, %v519_v25, 0.0  ;;  %v491_v29 = vsel %vm469_vm3, %v995_v24, 0.0 }
  0xfe   : > { %v537_v16 = vadd.f32 %v536_v11, %v535_v9  ;;  %v484_v17 = vadd.f32 %v483_v12, %v482_v8  ;;  %466 = vst.msk [vmem:[%s985_s10 + $0x34] sm:$0xf] %vm452_vm2, %v731_v22  ;;  %v493_v37 = vsel %vm469_vm3, %v373_v53, 0.0  ;;  %v546_v40 = vsel %vm469_vm3, %v520_v31, 0.0 }
  0xff   : > { %v548_v15 = vsel %vm469_vm3, %v521_v33, 0.0  ;;  %v522_v41 = vmul.f32 %v376_v61, %v376_v61  ;;  %v523_v44 = vmul.f32 %v1025_v47, %v1025_v47  ;;  %v495_v45 = vsel %vm469_vm3, %v376_v61, 0.0 }
 0x100   : > { %v486_v20 = vadd.f32 %v485_v13, %v484_v17  ;;  %v539_v23 = vadd.f32 %v538_v18, %v537_v16  ;;  %v497_v24 = vsel %vm469_vm3, %v1025_v47, 0.0  ;;  %v524_v49 = vmul.f32 %v1032_v57, %v1032_v57 }
 0x101   : > { %v550_v50 = vsel %vm469_vm3, %v522_v41, 0.0  ;;  %v552_v53 = vsel %vm469_vm3, %v523_v44, 0.0  ;;  %v499_v54 = vsel %vm469_vm3, %v1032_v57, 0.0 }
 0x102   : > { %v541_v27 = vadd.f32 %v540_v19, %v539_v23  ;;  %v488_v28 = vadd.f32 %v487_v26, %v486_v20  ;;  %v554_v58 = vsel %vm469_vm3, %v524_v49, 0.0 }
 0x104   : > { %v490_v34 = vadd.f32 %v489_v30, %v488_v28  ;;  %v543_v35 = vadd.f32 %v542_v32, %v541_v27 }
 0x106   : > { %v545_v38 = vadd.f32 %v544_v36, %v543_v35  ;;  %v492_v39 = vadd.f32 %v491_v29, %v490_v34 }
 0x108   : > { %v494_v42 = vadd.f32 %v493_v37, %v492_v39  ;;  %v547_v43 = vadd.f32 %v546_v40, %v545_v38 }
 0x10a   : > { %v549_v46 = vadd.f32 %v548_v15, %v547_v43  ;;  %v496_v48 = vadd.f32 %v495_v45, %v494_v42 }
 0x10c   : > { %v498_v51 = vadd.f32 %v497_v24, %v496_v48  ;;  %v551_v52 = vadd.f32 %v550_v50, %v549_v46 }
 0x10e   : > { %v500_v55 = vadd.f32 %v499_v54, %v498_v51  ;;  %v553_v56 = vadd.f32 %v552_v53, %v551_v52 }
 0x110   : > { %v501_v59 = vrot.slane %v500_v55, 4  ;;  %v555_v60 = vadd.f32 %v554_v58, %v553_v56 }
 0x112   : > { %v502_v47 = vadd.f32 %v501_v59, %v500_v55  ;;  %v556_v61 = vrot.slane %v555_v60, 4 }
 0x114   : > { %v503_v62 = vrot.slane %v502_v47, 2  ;;  %v557_v63 = vadd.f32 %v556_v61, %v555_v60 }
 0x116   : > { %v504_v0 = vadd.f32 %v503_v62, %v502_v47  ;;  %v558_v1 = vrot.slane %v557_v63, 2 }
 0x118   : > { %v505_v2 = vrot.slane %v504_v0, 1  ;;  %v559_v3 = vadd.f32 %v558_v1, %v557_v63 }
 0x11a   : > { %v506_v57 = vadd.f32 %v505_v2, %v504_v0  ;;  %v560_v4 = vrot.slane %v559_v3, 1 }
 0x11c   : > { %508 = vst.msk [vmem:[%s172_s20] sm:$0x1] %vm507_vm4, %v506_v57  ;;  %v561_v5 = vadd.f32 %v560_v4, %v559_v3 }
 0x11e   : > { %562 = vst.msk [vmem:[%s172_s20 + $0x1] sm:$0x1] %vm507_vm4, %v561_v5 }
 0x11f   : > { %838 = shalt.err (!%p835_p3)
}
 0x120   : > { %s839_s5 = scalar_lea.hbm %s1098_s27, 32  ;;  %s843_s8 = scalar_lea.hbm %s1143_s3, 128 }
 0x121   : > { %p840_p4 = scmp.ne.s32.totalorder %s1098_s27, %s839_s5  ;;  %p844_p9 = scmp.lt.u32.totalorder %s1098_s27, %s1143_s3 }
 0x122   : > { %p845_p10 = scmp.lt.u32.totalorder %s843_s8, %s839_s5  ;;  %p847_p12 = scmp.lt.u32.totalorder %s839_s5, %s1098_s27 }
 0x123   : > { %p841_p7 = pnand %p840_p4, %p948_p5 }
 0x124   : > { %p846_p11 = por %p845_p10, %p844_p9 }
 0x125   : > { %p842_p8 = pneg %p841_p7 }
 0x126   : > { %p848_p13 = por %p847_p12, %p846_p11 }
 0x128   : > { %p849_p0 = pnand %p848_p13, %p842_p8 }
 0x12a   : > { %852 = shalt.err (!%p849_p0)
}
 0x12b   : > { %775 = dma.vmem_to_hbm [thread:$0]  (%p948_p5), %s1100_s24, 32, %s1098_s27, %s569_s28  }
 0x12c PF: > { %p781_p1 = scmp.ge.s32.totalorder %s887_s15, 2  ;;  %s606_s11 = sand.u32 1, %s875_s12  }
 0x12d   : > { %s607_s17 = scalar_lea.sflag [#allocation3], %s606_s11 }
 0x12e   : > { %p778_p2 = pnand %p781_p1, %p952_p6 }
 0x130   : > { %870 = dma.done.wait (!%p778_p2), %s607_s17, 32  }
 0x131   : > { %872 = vsyncadd (!%p778_p2), %s607_s17, 4294967264  ;;  %p14_p3 = scmp.ge.s32.totalorder %s935_s18, 6   ;;  %s1146_s12 = smov %s879_s13 }
 0x132   : > { %s1147_s13 = smov %s883_s14  ;;  %s1148_s14 = smov %s946_s21 }
 0x133   : > { %s1149_s15 = smov %s935_s18  ;;  %16 = sbr.rel (!%p14_p3) target bundleno = 3 (0x3), region = 75 }
 0x13a   :  { %612 = vsyncpa [#allocation3], 1 }
 0x13b   :  { %614 = vsyncpa [#allocation3 + $0x1], 1 }

</bundles_post_ra>
